<compile_context>
chip_gen: v5e
topology: v5e:2x2
jax: 0.10.0
libtpu: 0.0.40
codegen_flags: <defaults>
</compile_context>

<pallas_src>
import jax
import jax.numpy as jnp
from jax.experimental import pallas as pl
from jax.experimental.pallas import tpu as pltpu


def sa_kernel(x_ref, w1_ref, b1_ref, w2_ref, b2_ref, o_ref):
    # x_ref: (b_blk, C, ts) tile, channels-first, spatial (lane-dense) last.
    # o_ref: (b_blk, 1, ts)
    w1 = w1_ref[...]          # (mid, C)   conv1 weight with BN folded in
    b1 = b1_ref[...]          # (mid, 1)   conv1 bias with BN folded in
    w2 = w2_ref[...]          # (1, mid)   conv2 weight
    b2 = b2_ref[...]          # (1, 1)     conv2 bias
    # Static unroll over the (small) batch sub-block.
    for b in range(x_ref.shape[0]):
        x = x_ref[b]                                                    # (C, ts)
        h = jnp.dot(w1, x, preferred_element_type=jnp.float32) + b1     # (mid, ts)
        h = jnp.maximum(h, 0.0)
        y = jnp.dot(w2, h, preferred_element_type=jnp.float32) + b2     # (1, ts)
        o_ref[b] = jax.nn.sigmoid(y).astype(o_ref.dtype)


def _choose_tiling(N, C, S, itemsize=4, x_tile_budget_bytes=8 << 20):
    """Pick (b_blk, ts): spatial tile from a VMEM budget, batch sub-block for
    small problems."""
    # Largest spatial tile (multiple of 128) whose x block stays within budget
    # (Pallas double-buffers it -> 2x this resident in VMEM).
    max_ts = max(128, (x_tile_budget_bytes // max(C * itemsize, 1)) // 128 * 128)
    if S <= 128:
        ts = S                      # block == full array dim (allowed)
    else:
        ts = min((S // 128) * 128, max_ts)
    n_s = -(-S // ts)               # cdiv

    # Batch sub-block: only when one spatial tile covers S. Aim for ~1 MiB per
    # step, but keep >=2 grid blocks when N >= 2 (feeds both v7x TensorCores).
    b_blk = 1
    if n_s == 1 and N > 1:
        per_batch = C * ts * itemsize
        b_blk = min(N, max(1, (1 << 20) // max(per_batch, 1)))
        if b_blk >= N:
            b_blk = max(1, N // 2)
        while N % b_blk:            # make it divide N (avoid ragged batch blocks)
            b_blk -= 1
    return b_blk, ts


def sa_forward(x, params):
    """x: (N, C, D, H, W) float32 (PyTorch NCDHW convention)."""
    N, C, D, H, W = x.shape
    w1, b1, gamma, beta, rmean, rvar, w2, b2 = params
    mid = w1.shape[1]
    assert mid >= 1, "SA requires in_channels >= 16 (middle_channel >= 1)"
    eps = 1e-5  # matches PyTorch BatchNorm3d default

    # Fold BN (eval mode) into conv1's weight/bias.
    scale = gamma / jnp.sqrt(rvar + eps)                      # (mid,)
    shift = beta - rmean * scale                              # (mid,)
    w1f = (w1.T * scale[:, None]).astype(jnp.float32)         # (mid, C)
    b1f = (b1 * scale + shift).reshape(mid, 1).astype(jnp.float32)
    w2f = w2.reshape(mid, 1).T.astype(jnp.float32)            # (1, mid)
    b2f = b2.reshape(1, 1).astype(jnp.float32)

    # Channels-first, spatially flattened: (N, C, S). No pad, no transpose.
    S = D * H * W
    x3 = x.reshape(N, C, S)

    b_blk, ts = _choose_tiling(N, C, S, itemsize=x3.dtype.itemsize)
    grid = (N // b_blk, pl.cdiv(S, ts))   # ragged last spatial block handled by Pallas

    out = pl.pallas_call(
        sa_kernel,
        out_shape=jax.ShapeDtypeStruct((N, 1, S), x.dtype),
        grid_spec=pltpu.PrefetchScalarGridSpec(
            num_scalar_prefetch=0,
            grid=grid,
            in_specs=[
                pl.BlockSpec((b_blk, C, ts), lambda n, j: (n, 0, j)),  # x tile
                pl.BlockSpec((mid, C), lambda n, j: (0, 0)),           # folded conv1 W
                pl.BlockSpec((mid, 1), lambda n, j: (0, 0)),           # folded conv1 b
                pl.BlockSpec((1, mid), lambda n, j: (0, 0)),           # conv2 W
                pl.BlockSpec((1, 1), lambda n, j: (0, 0)),             # conv2 b
            ],
            out_specs=pl.BlockSpec((b_blk, 1, ts), lambda n, j: (n, 0, j)),
        ),
        compiler_params=pltpu.CompilerParams(
            dimension_semantics=("parallel", "parallel"),
            vmem_limit_bytes=32 * 1024 * 1024,
        ),
    )(x3, w1f, b1f, w2f, b2f)

    return out.reshape(N, 1, D, H, W)


def init_params(key, in_channels):
    """Deterministic synthetic parameters matching SA(in_channels) shapes."""
    mid = in_channels // 16
    k = jax.random.split(key, 8)
    # conv1: PyTorch weight (mid, C, 1,1,1) -> stored here as (C, mid)
    w1 = jax.random.normal(k[0], (in_channels, mid), jnp.float32) * 0.1
    b1 = jax.random.normal(k[1], (mid,), jnp.float32) * 0.1
    # BatchNorm3d(mid): gamma, beta, running_mean, running_var
    gamma = 1.0 + 0.1 * jax.random.normal(k[2], (mid,), jnp.float32)
    beta = 0.1 * jax.random.normal(k[3], (mid,), jnp.float32)
    rmean = 0.1 * jax.random.normal(k[4], (mid,), jnp.float32)
    rvar = 1.0 + 0.1 * jax.random.uniform(k[5], (mid,), jnp.float32)
    # conv2: PyTorch weight (1, mid, 1,1,1) -> (mid, 1)
    w2 = jax.random.normal(k[6], (mid, 1), jnp.float32) * 0.1
    b2 = jax.random.normal(k[7], (1,), jnp.float32) * 0.1
    return (w1, b1, gamma, beta, rmean, rvar, w2, b2)


def sa_reference(x, params):
    """Pure-JAX reference of the same forward (BN in eval mode)."""
    w1, b1, gamma, beta, rmean, rvar, w2, b2 = params
    eps = 1e-5
    xc = jnp.transpose(x, (0, 2, 3, 4, 1))                     # NDHWC
    h = jnp.einsum("ndhwc,cm->ndhwm", xc, w1) + b1
    h = (h - rmean) / jnp.sqrt(rvar + eps) * gamma + beta
    h = jnp.maximum(h, 0.0)
    y = jnp.einsum("ndhwm,mo->ndhwo", h, w2) + b2
    y = jax.nn.sigmoid(y)
    return jnp.transpose(y, (0, 4, 1, 2, 3))                   # (N,1,D,H,W)


if __name__ == "__main__":
    in_channels = 32            # mid = in_channels // 16 = 2
    N, D, H, W = 2, 4, 8, 8     # S = 256

    key = jax.random.PRNGKey(0)
    kx, kp = jax.random.split(key)
    x = jax.random.normal(kx, (N, in_channels, D, H, W), jnp.float32)
    params = init_params(kp, in_channels)

    out = jax.block_until_ready(sa_forward(x, params))
    ref = jax.block_until_ready(sa_reference(x, params))

    assert out.shape == (N, 1, D, H, W), out.shape
    assert jnp.allclose(out, ref, atol=1e-5, rtol=1e-5), "mismatch vs reference"

    print("KERNEL_OK")
</pallas_src>

<mosaic_0001>
module attributes {stable_mosaic.version = 11 : i64} {
  func.func @sa_kernel(%arg0: i32, %arg1: i32, %arg2: memref<1x32x256xf32, #tpu.memory_space<vmem>>, %arg3: memref<2x32xf32, #tpu.memory_space<vmem>>, %arg4: memref<2x1xf32, #tpu.memory_space<vmem>>, %arg5: memref<1x2xf32, #tpu.memory_space<vmem>>, %arg6: memref<1x1xf32, #tpu.memory_space<vmem>>, %arg7: memref<1x1x256xf32, #tpu.memory_space<vmem>>) attributes {dimension_semantics = [#tpu.dimension_semantics<parallel>, #tpu.dimension_semantics<parallel>], iteration_bounds = array<i64: 2, 1>, scalar_prefetch = 0 : i64, scratch_operands = 0 : i64, tpu.core_type = #tpu.core_type<tc>, window_params = [{transform_indices = @transform_0, window_bounds = array<i64: 1, 32, 256>}, {pipeline_mode = #tpu.pipeline_mode<synchronous>, transform_indices = @transform_1, window_bounds = array<i64: 2, 32>}, {pipeline_mode = #tpu.pipeline_mode<synchronous>, transform_indices = @transform_2, window_bounds = array<i64: 2, 1>}, {pipeline_mode = #tpu.pipeline_mode<synchronous>, transform_indices = @transform_3, window_bounds = array<i64: 1, 2>}, {pipeline_mode = #tpu.pipeline_mode<synchronous>, transform_indices = @transform_4, window_bounds = array<i64: 1, 1>}, {transform_indices = @transform_5, window_bounds = array<i64: 1, 1, 256>}]} {
    %c0 = arith.constant 0 : index
    %c0_0 = arith.constant 0 : index
    %0 = vector.load %arg3[%c0, %c0_0] : memref<2x32xf32, #tpu.memory_space<vmem>>, vector<2x32xf32>
    %c0_1 = arith.constant 0 : index
    %c0_2 = arith.constant 0 : index
    %1 = vector.load %arg4[%c0_1, %c0_2] : memref<2x1xf32, #tpu.memory_space<vmem>>, vector<2x1xf32>
    %c0_3 = arith.constant 0 : index
    %c0_4 = arith.constant 0 : index
    %2 = vector.load %arg5[%c0_3, %c0_4] : memref<1x2xf32, #tpu.memory_space<vmem>>, vector<1x2xf32>
    %c0_5 = arith.constant 0 : index
    %c0_6 = arith.constant 0 : index
    %3 = vector.load %arg6[%c0_5, %c0_6] : memref<1x1xf32, #tpu.memory_space<vmem>>, vector<1x1xf32>
    %c0_7 = arith.constant 0 : index
    %c0_8 = arith.constant 0 : index
    %c0_9 = arith.constant 0 : index
    %4 = vector.load %arg2[%c0_7, %c0_8, %c0_9] : memref<1x32x256xf32, #tpu.memory_space<vmem>>, vector<1x32x256xf32>
    %5 = vector.shape_cast %4 : vector<1x32x256xf32> to vector<32x256xf32>
    %cst = arith.constant dense<0.000000e+00> : vector<2x256xf32>
    %6 = tpu.matmul %0, %5, %cst {dimension_numbers = #tpu.dot_dimension_numbers<[1], [0], [0], [1], [0, 0, 1, 1], [], []>} : vector<2x32xf32>, vector<32x256xf32>, vector<2x256xf32> -> vector<2x256xf32>
    %7 = vector.broadcast %1 : vector<2x1xf32> to vector<2x256xf32>
    %8 = arith.addf %6, %7 : vector<2x256xf32>
    %cst_10 = arith.constant 0.000000e+00 : f32
    %9 = vector.broadcast %cst_10 : f32 to vector<2x256xf32>
    %10 = arith.maximumf %8, %9 : vector<2x256xf32>
    %cst_11 = arith.constant dense<0.000000e+00> : vector<1x256xf32>
    %11 = tpu.matmul %2, %10, %cst_11 {dimension_numbers = #tpu.dot_dimension_numbers<[1], [0], [0], [1], [0, 0, 1, 1], [], []>} : vector<1x2xf32>, vector<2x256xf32>, vector<1x256xf32> -> vector<1x256xf32>
    %12 = vector.broadcast %3 : vector<1x1xf32> to vector<1x256xf32>
    %13 = arith.addf %11, %12 : vector<1x256xf32>
    %14 = arith.negf %13 : vector<1x256xf32>
    %15 = math.exp %14 : vector<1x256xf32>
    %cst_12 = arith.constant 1.000000e+00 : f32
    %16 = vector.broadcast %cst_12 : f32 to vector<1x256xf32>
    %17 = arith.addf %16, %15 : vector<1x256xf32>
    %18 = arith.divf %16, %17 : vector<1x256xf32>
    %c0_13 = arith.constant 0 : index
    %c0_14 = arith.constant 0 : index
    %c0_15 = arith.constant 0 : index
    %19 = vector.load %arg7[%c0_13, %c0_14, %c0_15] : memref<1x1x256xf32, #tpu.memory_space<vmem>>, vector<1x1x256xf32>
    %20 = vector.shape_cast %19 : vector<1x1x256xf32> to vector<1x256xf32>
    %21 = vector.shape_cast %18 : vector<1x256xf32> to vector<1x1x256xf32>
    tpu.vector_store %arg7[%c0_13, %c0_14, %c0_15], %21 {strides = array<i32>} : memref<1x1x256xf32, #tpu.memory_space<vmem>>, vector<1x1x256xf32>,
    return
  }
  func.func @transform_0(%arg0: i32, %arg1: i32) -> (i32, i32, i32) {
    %c0_i32 = arith.constant 0 : i32
    %c0_i32_0 = arith.constant 0 : i32
    return %arg0, %c0_i32, %arg1 : i32, i32, i32
  }
  func.func @transform_1(%arg0: i32, %arg1: i32) -> (i32, i32) {
    %c0_i32 = arith.constant 0 : i32
    %c0_i32_0 = arith.constant 0 : i32
    %c0_i32_1 = arith.constant 0 : i32
    return %c0_i32, %c0_i32_0 : i32, i32
  }
  func.func @transform_2(%arg0: i32, %arg1: i32) -> (i32, i32) {
    %c0_i32 = arith.constant 0 : i32
    %c0_i32_0 = arith.constant 0 : i32
    %c0_i32_1 = arith.constant 0 : i32
    return %c0_i32, %c0_i32_0 : i32, i32
  }
  func.func @transform_3(%arg0: i32, %arg1: i32) -> (i32, i32) {
    %c0_i32 = arith.constant 0 : i32
    %c0_i32_0 = arith.constant 0 : i32
    %c0_i32_1 = arith.constant 0 : i32
    return %c0_i32, %c0_i32_0 : i32, i32
  }
  func.func @transform_4(%arg0: i32, %arg1: i32) -> (i32, i32) {
    %c0_i32 = arith.constant 0 : i32
    %c0_i32_0 = arith.constant 0 : i32
    %c0_i32_1 = arith.constant 0 : i32
    return %c0_i32, %c0_i32_0 : i32, i32
  }
  func.func @transform_5(%arg0: i32, %arg1: i32) -> (i32, i32, i32) {
    %c0_i32 = arith.constant 0 : i32
    %c0_i32_0 = arith.constant 0 : i32
    return %arg0, %c0_i32, %arg1 : i32, i32, i32
  }
}

</mosaic_0001>

<bundles_post_ra>
// kernel: tpu_custom_call.1
= control target key start
LH: loop header
LB: loop body
LE: loop exit
PB: predicated region body
PF: predicated region fallthrough
CT: control target
= control target key end

     0   :  { %s920_s0 = inlined_call_operand.hbm [shape: f32[2,32,256], index: 0, kind: input, shape index: {}]   ;;  %s921_s1 = inlined_call_operand.vmem [shape: f32[2,32], index: 1, kind: input, shape index: {}]   ;;  %s922_s2 = inlined_call_operand.vmem [shape: f32[2,1], index: 2, kind: input, shape index: {}]   ;;  %s923_s3 = inlined_call_operand.vmem [shape: f32[1,2], index: 3, kind: input, shape index: {}]   ;;  %s924_s4 = inlined_call_operand.<no memory space> [shape: f32[1,1], index: 4, kind: input, shape index: {}]   ;;  %s925_s5 = inlined_call_operand.hbm [shape: f32[2,1,256], index: 5, kind: output, shape index: {}]  }
   0x1   :  { %v10_v0 = vstv %s924_s4 }
   0x2   :  { %11 = vst [vmem:[#allocation2] sm:$0x1] %v10_v0 }
   0x3   :  { %12 = vsyncpa [#allocation4], 0 }
   0x4   :  { %14 = vsyncpa [#allocation4 + $0x1], 0 }
   0x5   :  { %15 = vsyncpa [#allocation5], 0 }
   0x6   :  { %17 = vsyncpa [#allocation5 + $0x1], 0  ;;  %s784_s20 = smov 0   ;;  %s786_s21 = smov 0  }
   0x7   :  { %s788_s22 = smov 0   ;;  %s790_s23 = smov 0  }
   0x8   :  { %s792_s24 = smov 0   ;;  %s794_s25 = smov 0  }
   0x9 LB: > { %s537_s4 = sadd.s32 4294967295, %s746_s25   ;;  %s538_s26 = sadd.s32 4294967294, %s746_s25   ;;  %s746_s25 = sphi %s794_s25, %s23_s25   ;;  %s742_s24 = sphi %s792_s24, %s936_s24   ;;  %s738_s23 = sphi %s790_s23, %s935_s23   ;;  %s734_s22 = sphi %s788_s22, %s934_s22   ;;  %s730_s21 = sphi %s786_s21, %s933_s21   ;;  %s726_s20 = sphi %s784_s20, %s932_s20  }
   0xa   : > { %s35_s27 = sadd.s32 1, %s742_s24  ;;  %s44_s28 = sadd.s32 1, %s734_s22 }
   0xb   : > { %p37_p0 = scmp.ge.s32.totalorder %s35_s27, 2  ;;  %p51_p1 = scmp.ne.s32.totalorder %s734_s22, %s730_s21 }
   0xc   : > { %p52_p2 = scmp.eq.s32.totalorder %s746_s25, 0  ;;  %p57_p3 = scmp.ne.s32.totalorder %s730_s21, %s726_s20 }
   0xd   : > { %s938_s27 = smov (%p37_p0, %s35_s27), 0  ;;  %p58_p5 = scmp.eq.s32.totalorder %s537_s4, 0 }
   0xe   : > { %p825_p4 = por %p52_p2, %p51_p1  ;;  %s39_s30 = ssub.s32 %s742_s24, %s938_s27 }
   0xf   : > { %p167_p6 = scmp.eq.s32.totalorder %s537_s4, 1  ;;  %p42_p7 = scmp.eq.s32.totalorder %s39_s30, 0 }
  0x10   : > { %p831_p8 = por %p58_p5, %p57_p3  ;;  %p173_p10 = scmp.eq.s32.totalorder %s538_s26, 1 }
  0x11   : > { %p835_p9 = por %p167_p6, %p51_p1  ;;  %p540_p12 = scmp.ge.s32.totalorder %s746_s25, 2 }
  0x12   : > { %s840_s8 = scalar_select %p42_p7, %s734_s22, %s44_s28  }
  0x13   : > { %p842_p11 = por %p173_p10, %p57_p3  ;;  %p572_p13 = scmp.lt.s32.totalorder %s746_s25, 2 }
  0x14   : > { %s205_s10 = sand.u32 1, %s734_s22   ;;  %s559_s12 = sshll.u32 %s742_s24, 6 }
  0x15   : > { %s541_s11 = sshll.u32 %s205_s10, 6  ;;  %s216_s15 = scalar_lea.hbm %s920_s0, %s559_s12 }
  0x16   : > { %s209_s16 = scalar_lea.vmem [#allocation3], %s541_s11  ;;  %s217_s18 = sshll.u32 %s216_s15, 4  ;;  %s218_s18 = int_to_ptr.hbm [resolvable:$true] %s217_s18 }
  0x17   : > { %s219_s17 = sshll.u32 %s209_s16, 4  ;;  %p565_p0 = pnand %p572_p13, %p825_p4  ;;  %s220_s17 = int_to_ptr.vmem [resolvable:$true] %s219_s17 }
  0x18   : > { %p544_p1 = scmp.ge.s32.totalorder %s746_s25, 1  ;;  %s206_s19 = scalar_lea.sflag [#allocation4], %s205_s10 }
  0x19   : > { %s748_s4 = smov 256   ;;  %s749_s26 = smov 16  }
  0x1a   : > { %567 = dma.hbm_to_vmem [thread:$0]  (!%p565_p0), %s218_s18, 1024, %s220_s17, %s206_s19, %s748_s4, %s748_s4, %s749_s26  }
  0x1b   : > { %p227_p2 = scmp.lt.s32.totalorder %s746_s25, 3 }
  0x1d   : > { %p228_p3 = pnand %p544_p1, %p227_p2 }
  0x1e   : > { %s858_s28 = sand.u32 (!%p228_p3), 1, %s730_s21  }
  0x1f   : > { %231 = sbr.rel (%p228_p3) target bundleno = 345 (0x159), region = 40  ;;  %s545_s30 = sshll.u32 (!%p228_p3), %s858_s28, 6 }
  0x20   : > { %s234_s11 = scalar_lea.sflag (!%p228_p3), [#allocation4], %s858_s28  ;;  %s237_s12 = scalar_lea.vmem (!%p228_p3), [#allocation3], %s545_s30 }
  0x24   : > { %717 = dma.done.wait (%p831_p8), %s234_s11, 1024  }
  0x25   : > { %719 = vsyncadd (%p831_p8), %s234_s11, 4294966272  ;;  %v750_v1 = vmov 0   ;;  %v277_v2 = vld [vmem:[%s237_s12 + $0x30] sm:$0xff]  ;;  %v278_v3 = vld [vmem:[%s237_s12 + $0x38] sm:$0xff]  ;;  %vm284_vm0 = vcmask 261120   ;;  %vm340_vm1 = vcmask 1041408   ;;  %v431_v48 = vlaneseq }
  0x26   : > { %625 = vset.pattern.permute.xlu0 %v750_v1  ;;  %v275_v4 = vld [vmem:[%s237_s12 + $0x20] sm:$0xff]  ;;  %300 = vmatpush.msra.mxu0 %v277_v2  ;;  %v276_v5 = vld [vmem:[%s237_s12 + $0x28] sm:$0xff]  ;;  %v273_v6 = vld [vmem:[%s237_s12 + $0x10] sm:$0xff]  ;;  %vm336_vm2 = vcmask 15360   ;;  %s546_s16 = sshll.u32 %s858_s28, 1  ;;  %s556_s17 = sshll.u32 %s738_s23, 1 }
  0x27   : > { %320 = vmatpush.msra.mxu1 %v278_v3  ;;  %v274_v7 = vld [vmem:[%s237_s12 + $0x18] sm:$0xff]  ;;  %v271_v9 = vld [vmem:[%s237_s12] sm:$0xff]  ;;  %v272_v10 = vld [vmem:[%s237_s12 + $0x8] sm:$0xff]  ;;  %s449_s4 = scalar_lea.hbm %s925_s5, %s556_s17  ;;  %s264_s23 = scalar_lea.vmem [#allocation6], %s546_s16  ;;  %vm428_vm10 = vcmask 1040384   ;;  %vm433_vm12 = vcmp.lt.s32.totalorder %v431_v48, 256 }
  0x28   : > { %301 = vmatpush.msra.mxu0 %v275_v4  ;;  %v268_v8 = vld [vmem:[%s922_s2] sm:$0x3]  ;;  %s451_s26 = sshll.u32 %s264_s23, 4  ;;  %s453_s30 = sshll.u32 %s449_s4, 4  ;;  %s452_s26 = int_to_ptr.vmem [resolvable:$true] %s451_s26  ;;  %s454_s30 = int_to_ptr.hbm [resolvable:$true] %s453_s30 }
  0x29   : > { %321 = vmatpush.msra.mxu1 %v276_v5  ;;  %281 = vperm.xlu0 %625, %v268_v8   ;;  %v267_v11 = vld [vmem:[%s921_s1] sm:$0x3]  ;;  %s437_s11 = scalar_lea.sflag [#allocation5], %s858_s28  ;;  %s678_s12 = sshra.s32 %s454_s30, 4  ;;  %s679_s12 = int_to_ptr.hbm [resolvable:$true] %s678_s12 }
  0x2a   : > { %302 = vmatpush.msra.mxu0 %v273_v6  ;;  %v270_v12 = vld [vmem:[#allocation2] sm:$0x1]  ;;  %s680_s29 = scalar_lea.hbm %s679_s12, 2  ;;  %s684_s13 = scalar_lea.hbm %s925_s5, 4 }
  0x2b   : > { %322 = vmatpush.msra.mxu1 %v274_v7  ;;  %v269_v20 = vld [vmem:[%s923_s3] sm:$0x1]  ;;  %p681_p4 = scmp.ne.s32.totalorder %s679_s12, %s680_s29  ;;  %p685_p7 = scmp.lt.s32.totalorder %s679_s12, %s925_s5 }
  0x2c   : > { %303 = vmatpush.msra.mxu0 %v271_v9  ;;  %p686_p8 = scmp.lt.s32.totalorder %s684_s13, %s680_s29 }
  0x2d   : > { %323 = vmatpush.msra.mxu1 %v272_v10  ;;  %547 = vmatmul.msk.f32.vlgmr.msra.gmra.mxu0 %vm284_vm0, %v267_v11  ;;  %p682_p5 = pnand %p681_p4, %p835_p9 }
  0x2e   : > { %548 = vmatmul.msk.f32.vlgmr.msra.gmra.mxu1 %vm284_vm0, %v267_v11  ;;  %p687_p10 = por %p686_p8, %p685_p7 }
  0x2f   : > { %p683_p6 = pneg %p682_p5 }
  0x31   : > { %332 = vperm.xlu0 %625, %v270_v12   ;;  %p688_p13 = pnand %p687_p10, %p683_p6 }
  0x9b   : > { %v282_v13 = vpop.permute.xlu0 %281 }
  0xa3   : > { %v333_v21 = vpop.permute.xlu0 %332 }
  0xa4   : > { %v335_v22 = vperm.slane %v333_v21, 0 }
  0xaa   : > { %v305_v14 = vpop.f32.mrf.mxu0 }
  0xab   : > { %v325_v15 = vpop.f32.mrf.mxu1  ;;  %v306_v16 = vadd.f32 %v305_v14, %v282_v13 }
  0xac   : > { %v326_v17 = vadd.f32 %v325_v15, %v282_v13 }
  0xad   : > { %v328_v18 = vmax.f32 %v306_v16, 0.0 }
  0xae   : > { %v329_v19 = vmax.f32 %v326_v17, 0.0 }
  0xaf   : > { %549 = vmatpush.msk.msra.mxu2 %vm340_vm1, %v328_v18 }
  0xb0   : > { %551 = vmatpush.msk.msra.mxu3 %vm340_vm1, %v329_v19  ;;  %550 = vmatmul.msk.f32.vlgmr.msra.gmra.mxu2 %vm336_vm2, %v269_v20 }
  0xb1   : > { %552 = vmatmul.msk.f32.vlgmr.msra.gmra.mxu3 %vm336_vm2, %v269_v20 }
 0x133   : > { %v364_v23 = vpop.f32.mrf.mxu2 }
 0x134   : > { %v384_v24 = vpop.f32.mrf.mxu3  ;;  %v365_v25 = vadd.f32 %v364_v23, %v335_v22 }
 0x135   : > { %v385_v26 = vadd.f32 %v384_v24, %v335_v22 }
 0x136   : > { %v553_v27 = vmul.f32 -1.442695, %v365_v25 }
 0x137   : > { %v554_v28 = vmul.f32 -1.442695, %v385_v26 }
 0x138   : > { %626 = vpow2.f32 %v553_v27 }
 0x139   : > { %628 = vpow2.f32 %v554_v28 }
 0x13e   : > { %v627_v29 = vpop.eup %626 }
 0x13f   : > { %v629_v30 = vpop.eup %628  ;;  %v393_v31 = vadd.f32 1.0, %v627_v29 }
 0x140   : > { %v394_v32 = vadd.f32 1.0, %v629_v30 }
 0x141   : > { %630 = vrcp.f32 %v393_v31  ;;  %vm400_vm5 = vweird.f32 %v393_v31  ;;  %v406_v43 = vand.u32 2147483648, %v393_v31  ;;  %v404_v47 = vand.u32 2147483647, %v393_v31 }
 0x142   : > { %632 = vrcp.f32 %v394_v32  ;;  %v421_v40 = vand.u32 2147483648, %v394_v32  ;;  %v419_v42 = vand.u32 2147483647, %v394_v32  ;;  %vm415_vm6 = vweird.f32 %v394_v32 }
 0x143   : > { %v407_v52 = vor.u32 1.1754944e-38, %v406_v43  ;;  %vm405_vm11 = vcmp.eq.f32.partialorder %v404_v47, 8.507059e+37 }
 0x144   : > { %v422_v49 = vor.u32 1.1754944e-38, %v421_v40  ;;  %vm420_vm9 = vcmp.eq.f32.partialorder %v419_v42, 8.507059e+37 }
 0x147   : > { %v631_v33 = vpop.eup %630 }
 0x148   : > { %v633_v34 = vpop.eup %632  ;;  %v396_v35 = vmul.f32 %v631_v33, %v393_v31  ;;  %vm401_vm3 = vweird.f32 %v631_v33 }
 0x149   : > { %v411_v36 = vmul.f32 %v633_v34, %v394_v32  ;;  %vm416_vm4 = vweird.f32 %v633_v34  ;;  %vm880_vm7 = vmor %vm400_vm5, %vm401_vm3 }
 0x14a   : > { %v397_v37 = vsub.f32 1.0, %v396_v35  ;;  %vm417_vm8 = vmor %vm415_vm6, %vm416_vm4 }
 0x14b   : > { %v412_v38 = vsub.f32 1.0, %v411_v36 }
 0x14c   : > { %v398_v39 = vmul.f32 %v631_v33, %v397_v37 }
 0x14d   : > { %v413_v41 = vmul.f32 %v633_v34, %v412_v38 }
 0x14e   : > { %v399_v44 = vadd.f32 %v631_v33, %v398_v39 }
 0x14f   : > { %v414_v45 = vadd.f32 %v633_v34, %v413_v41 }
 0x150   : > { %v403_v50 = vsel %vm880_vm7, %v631_v33, %v399_v44 }
 0x151   : > { %v418_v51 = vsel %vm417_vm8, %v633_v34, %v414_v45  ;;  %v408_v55 = vsel %vm405_vm11, %v407_v52, %v403_v50 }
 0x152   : > { %v423_v53 = vsel %vm420_vm9, %v422_v49, %v418_v51 }
 0x153   : > { %v427_v54 = vrot.slane %v423_v53, 7 }
 0x155   : > { %v429_v56 = vsel %vm428_vm10, %v408_v55, %v427_v54 }
 0x156   : > { %435 = vst.msk [vmem:[%s264_s23] sm:$0x3] %vm433_vm12, %v429_v56 }
 0x157   : > { %691 = shalt.err (!%p688_p13)
}
 0x158   : > { %562 = dma.vmem_to_hbm [thread:$0]  (%p835_p9), %s452_s26, 32, %s454_s30, %s437_s11  }
 0x159 PF: > { %s465_s28 = sand.u32 1, %s726_s20   ;;  %p569_p0 = pnand %p540_p12, %p842_p11 }
 0x15a   : > { %s466_s16 = scalar_lea.sflag [#allocation5], %s465_s28 }
 0x15b   : > { %p570_p1 = pneg %p569_p0 }
 0x15d   : > { %721 = dma.done.wait (%p570_p1), %s466_s16, 32  }
 0x15e   : > { %723 = vsyncadd (%p570_p1), %s466_s16, 4294967264  ;;  %s23_s25 = sadd.s32 1, %s746_s25   ;;  %s932_s20 = smov %s730_s21 }
 0x15f   : > { %p20_p2 = scmp.ge.s32.totalorder %s23_s25, 4   ;;  %s933_s21 = smov %s734_s22 }
 0x160   : > { %s934_s22 = smov %s840_s8  ;;  %s935_s23 = smov %s742_s24 }
 0x161   : > { %s936_s24 = smov %s938_s27  ;;  %22 = sbr.rel (!%p20_p2) target bundleno = 9 (0x9), region = 85 }
 0x166   :  { %472 = vsyncpa [#allocation4], 1 }
 0x167   :  { %474 = vsyncpa [#allocation4 + $0x1], 1 }
 0x168   :  { %475 = vsyncpa [#allocation5], 1 }
 0x169   :  { %477 = vsyncpa [#allocation5 + $0x1], 1 }

</bundles_post_ra>
